<compile_context>
chip_gen: v7x
topology: tpu7x:2x2x1
jax: 0.10.0
libtpu: 0.0.40
codegen_flags: <defaults>
</compile_context>

<pallas_src>
import functools

import jax
import jax.numpy as jnp
from jax.experimental import pallas as pl
from jax.experimental.pallas import tpu as pltpu

_LANES = 128
_TARGET_BLOCK_BYTES = 8 * 1024 * 1024  # ~8 MiB output tile per grid step


def _plain_kernel(inv_ref, o_ref):
    """o[r, :] = (global row r) * inv_freq_full   -- layout (tm, dim)."""
    tm, _ = o_ref.shape
    row = jax.lax.broadcasted_iota(jnp.int32, (tm, 1), 0).astype(jnp.float32)
    base = (pl.program_id(0) * tm).astype(jnp.float32)
    o_ref[...] = ((row + base) * inv_ref[...]).astype(o_ref.dtype)


def _packed_kernel(inv_ref, off_ref, o_ref, *, k):
    """Lane-dense layout: each 128-lane row holds k consecutive positions.

    Lane l of packed row r corresponds to position r*k + l//dim and feature
    l % dim; off_ref holds (l // dim) and inv_ref holds inv_freq_full[l % dim].
    """
    tm, _ = o_ref.shape
    row = jax.lax.broadcasted_iota(jnp.int32, (tm, 1), 0).astype(jnp.float32)
    base = (pl.program_id(0) * (tm * k)).astype(jnp.float32)
    pos = row * jnp.float32(k) + base + off_ref[...]
    o_ref[...] = (pos * inv_ref[...]).astype(o_ref.dtype)


def _pick_row_tile(rows, row_bytes, total_bytes, target_block_bytes):
    """Byte-sized row tile (multiple of 8); split into >=2 steps when big."""
    tm = max(target_block_bytes // row_bytes, 8)
    tm = (tm // 8) * 8
    if tm >= rows:
        if total_bytes >= (2 << 20) and rows > 8:
            # Non-trivial output but a single block would cover it: split into
            # two steps so both v7x TensorCores get work (harmless elsewhere).
            tm = (((rows + 1) // 2) + 7) // 8 * 8
        else:
            tm = rows  # full-extent block (always legal)
    return int(tm)


def rotary_embedding(max_seq_len: int, dim: int, *,
                     out_dtype=jnp.float32,
                     target_block_bytes: int = _TARGET_BLOCK_BYTES):
    """Returns the (max_seq_len, dim) RoPE frequency table."""
    assert dim % 2 == 0, "RotaryEmbedding requires an even dim"

    # Same constants as the PyTorch buffer, duplicated so the kernel writes
    # cat((freqs, freqs), -1) directly (no in-kernel concat).
    inv_freq = 1.0 / (10000.0 ** (jnp.arange(0, dim, 2, dtype=jnp.float32) / dim))
    inv_freq_full = jnp.concatenate([inv_freq, inv_freq])  # (dim,)

    itemsize = jnp.dtype(out_dtype).itemsize
    total_bytes = max_seq_len * dim * itemsize

    # Lane-dense packing when dim divides 128 and S divides evenly into groups.
    packed = (dim < _LANES) and (_LANES % dim == 0) \
        and (max_seq_len % (_LANES // dim) == 0)

    if packed:
        k = _LANES // dim
        rows, width = max_seq_len // k, _LANES
        lane_inv = jnp.tile(inv_freq_full, k).reshape(1, width)
        lane_off = (jnp.arange(width, dtype=jnp.float32) // dim).reshape(1, width)
        operands = (lane_inv, lane_off)
        in_specs = [pl.BlockSpec((1, width), lambda i: (0, 0)),
                    pl.BlockSpec((1, width), lambda i: (0, 0))]
        kernel = functools.partial(_packed_kernel, k=k)
    else:
        rows, width = max_seq_len, dim
        operands = (inv_freq_full.reshape(1, dim),)
        in_specs = [pl.BlockSpec((1, dim), lambda i: (0, 0))]
        kernel = _plain_kernel

    row_bytes = width * itemsize
    tm = _pick_row_tile(rows, row_bytes, total_bytes, target_block_bytes)
    grid = (pl.cdiv(rows, tm),)

    # Double-buffered output block + tiny resident inputs, with headroom.
    block_bytes = tm * row_bytes
    vmem_limit = min(max(2 * block_bytes + 8 * width * 4 + (1 << 20), 16 << 20),
                     32 << 20)

    out = pl.pallas_call(
        kernel,
        out_shape=jax.ShapeDtypeStruct((rows, width), out_dtype),
        grid_spec=pltpu.PrefetchScalarGridSpec(
            num_scalar_prefetch=0,
            grid=grid,
            in_specs=in_specs,                    # constant index map -> VMEM-resident
            out_specs=pl.BlockSpec((tm, width), lambda i: (i, 0)),
        ),
        compiler_params=pltpu.CompilerParams(
            dimension_semantics=("parallel",),    # megacore-shardable on v7x
            vmem_limit_bytes=vmem_limit,
        ),
        cost_estimate=pl.CostEstimate(
            flops=2 * max_seq_len * dim,
            transcendentals=0,
            bytes_accessed=total_bytes + sum(int(op.size) * 4 for op in operands),
        ),
    )(*operands)

    if packed:
        # Free: packed (S//k, k*dim) and (S, dim) share the same row-major layout.
        out = out.reshape(max_seq_len, dim)
    return out


def rotary_embedding_ref(max_seq_len: int, dim: int):
    """Plain-JAX reference matching the PyTorch forward exactly."""
    seq = jnp.arange(max_seq_len, dtype=jnp.float32)
    inv_freq = 1.0 / (10000.0 ** (jnp.arange(0, dim, 2, dtype=jnp.float32) / dim))
    freqs = jnp.einsum("i,j->ij", seq, inv_freq)
    return jnp.concatenate([freqs, freqs], axis=-1)


if __name__ == "__main__":
    # Inputs to this module are deterministic integer positions; the PRNG key
    # is created only to follow the harness convention (unused).
    _ = jax.random.PRNGKey(0)

    # 1. Small shape consistent with the module (dim=32, max_seq_len=8):
    #    lane-dense packed path (k=4), single grid step.
    out = rotary_embedding(8, 32)
    jax.block_until_ready(out)
    assert out.shape == (8, 32)
    assert jnp.allclose(out, rotary_embedding_ref(8, 32), atol=1e-6, rtol=1e-6)

    # 2. Packed path with a multi-step grid and ragged last block (small
    #    target tile to force grid > 1 at test scale).
    out2 = rotary_embedding(1040, 64, target_block_bytes=64 * 1024)
    jax.block_until_ready(out2)
    assert out2.shape == (1040, 64)
    assert jnp.allclose(out2, rotary_embedding_ref(1040, 64), atol=1e-5, rtol=1e-5)

    # 3. Fallback (unpacked) path: odd sequence length with dim=64.
    out3 = rotary_embedding(1037, 64)
    jax.block_until_ready(out3)
    assert jnp.allclose(out3, rotary_embedding_ref(1037, 64), atol=1e-5, rtol=1e-5)

    # 4. Plain path with last dim > 128 and a multi-step, ragged grid.
    out4 = rotary_embedding(1037, 160, target_block_bytes=64 * 1024)
    jax.block_until_ready(out4)
    assert jnp.allclose(out4, rotary_embedding_ref(1037, 160), atol=1e-5, rtol=1e-5)

    print("KERNEL_OK")
</pallas_src>

<mosaic_0001>
module attributes {stable_mosaic.version = 11 : i64} {
  func.func @_packed_kernel(%arg0: i32, %arg1: memref<1x128xf32, #tpu.memory_space<vmem>>, %arg2: memref<1x128xf32, #tpu.memory_space<vmem>>, %arg3: memref<2x128xf32, #tpu.memory_space<vmem>>) attributes {dimension_semantics = [#tpu.dimension_semantics<parallel>], iteration_bounds = array<i64: 1>, scalar_prefetch = 0 : i64, scratch_operands = 0 : i64, tpu.core_type = #tpu.core_type<tc>, window_params = [{pipeline_mode = #tpu.pipeline_mode<synchronous>, transform_indices = @transform_0, window_bounds = array<i64: 1, 128>}, {pipeline_mode = #tpu.pipeline_mode<synchronous>, transform_indices = @transform_1, window_bounds = array<i64: 1, 128>}, {transform_indices = @transform_2, window_bounds = array<i64: 2, 128>}]} {
    %0 = tpu.iota {dimensions = array<i32: 0>} : vector<2x1xi32>
    %1 = arith.sitofp %0 : vector<2x1xi32> to vector<2x1xf32>
    %c8_i32 = arith.constant 8 : i32
    %2 = arith.muli %arg0, %c8_i32 : i32
    %3 = arith.sitofp %2 : i32 to f32
    %cst = arith.constant 4.000000e+00 : f32
    %4 = vector.broadcast %cst : f32 to vector<2x1xf32>
    %5 = arith.mulf %1, %4 : vector<2x1xf32>
    %6 = vector.broadcast %3 : f32 to vector<2x1xf32>
    %7 = arith.addf %5, %6 : vector<2x1xf32>
    %c0 = arith.constant 0 : index
    %c0_0 = arith.constant 0 : index
    %8 = vector.load %arg2[%c0, %c0_0] : memref<1x128xf32, #tpu.memory_space<vmem>>, vector<1x128xf32>
    %9 = vector.broadcast %7 : vector<2x1xf32> to vector<2x128xf32>
    %10 = vector.broadcast %8 : vector<1x128xf32> to vector<2x128xf32>
    %11 = arith.addf %9, %10 : vector<2x128xf32>
    %c0_1 = arith.constant 0 : index
    %c0_2 = arith.constant 0 : index
    %12 = vector.load %arg1[%c0_1, %c0_2] : memref<1x128xf32, #tpu.memory_space<vmem>>, vector<1x128xf32>
    %13 = vector.broadcast %12 : vector<1x128xf32> to vector<2x128xf32>
    %14 = arith.mulf %11, %13 : vector<2x128xf32>
    %c0_3 = arith.constant 0 : index
    %c0_4 = arith.constant 0 : index
    %15 = vector.load %arg3[%c0_3, %c0_4] : memref<2x128xf32, #tpu.memory_space<vmem>>, vector<2x128xf32>
    tpu.vector_store %arg3[%c0_3, %c0_4], %14 {strides = array<i32>} : memref<2x128xf32, #tpu.memory_space<vmem>>, vector<2x128xf32>,
    return
  }
  func.func @transform_0(%arg0: i32) -> (i32, i32) {
    %c0_i32 = arith.constant 0 : i32
    %c0_i32_0 = arith.constant 0 : i32
    %c0_i32_1 = arith.constant 0 : i32
    return %c0_i32, %c0_i32_0 : i32, i32
  }
  func.func @transform_1(%arg0: i32) -> (i32, i32) {
    %c0_i32 = arith.constant 0 : i32
    %c0_i32_0 = arith.constant 0 : i32
    %c0_i32_1 = arith.constant 0 : i32
    return %c0_i32, %c0_i32_0 : i32, i32
  }
  func.func @transform_2(%arg0: i32) -> (i32, i32) {
    %c0_i32 = arith.constant 0 : i32
    %c0_i32_0 = arith.constant 0 : i32
    return %arg0, %c0_i32 : i32, i32
  }
}

</mosaic_0001>

<bundles_post_ra>
// kernel: tpu_custom_call.1
= control target key start
LH: loop header
LB: loop body
LE: loop exit
PB: predicated region body
PF: predicated region fallthrough
CT: control target
= control target key end

     0   :  { %7 = vsyncpa [#allocation3], 0  ;;  %s160_s0 = inlined_call_operand.hbm [shape: f32[1,128], index: 0, kind: input, shape index: {}]   ;;  %s161_s1 = inlined_call_operand.vmem [shape: f32[1,128], index: 1, kind: input, shape index: {}]   ;;  %s162_s2 = inlined_call_operand.hbm [shape: f32[2,128], index: 2, kind: output, shape index: {}]  }
   0x1   :  { %8 = vsyncpa [#allocation4], 0  ;;  %s116_s9 = smov [#allocation2]   ;;  %s68_s13 = scalar_lea.hbm %s160_s0, 16 }
   0x2   :  { %s15_s10 = sshll.u32 %s116_s9, 4  ;;  %p69_p0 = scmp.ne.s32.totalorder %s160_s0, %s68_s13  ;;  %s16_s10 = int_to_ptr.vmem [resolvable:$true] %s15_s10 }
   0x3   :  { %p72_p1 = scmp.lt.u32.totalorder %s68_s13, %s160_s0 }
   0x5   :  { %p74_p2 = pnand %p72_p1, %p69_p0 }
   0x7   :  { %77 = shalt.err (!%p74_p2)
}
   0x8   :  { %s78_s18 = scalar_lea.vmem %s16_s10, 16  ;;  %s82_s19 = scalar_lea.vmem %s16_s10, 32 }
   0x9   :  { %p79_p3 = scmp.ne.s32.totalorder %s16_s10, %s78_s18  ;;  %p83_p4 = scmp.lt.s32.totalorder %s16_s10, %s16_s10 }
   0xa   :  { %p84_p5 = scmp.lt.s32.totalorder %s82_s19, %s78_s18 }
   0xc   :  { %p85_p6 = por %p84_p5, %p83_p4 }
   0xe   :  { %p86_p7 = pnand %p85_p6, %p79_p3 }
  0x10   :  { %89 = shalt.err (!%p86_p7)
}
  0x11   :  { %18 = dma.hbm_to_vmem [thread:$0]  %s160_s0, 16, %s16_s10, [#allocation3]  }
  0x12   :  { %112 = dma.done.wait [#allocation3], 16  }
  0x13   :  { %113 = vsyncadd [#allocation3], 4294967280  ;;  %v24_v0 = vlaneseq  ;;  %v64_v4 = vld [vmem:[%s161_s1] ss:$0 sm:$0xff]  ;;  %s117_s24 = smov [#allocation5]  }
  0x14   :  { %v65_v5 = vld [vmem:[#allocation2] ss:$0 sm:$0xff]  ;;  %s55_s25 = sshll.u32 %s117_s24, 4  ;;  %s56_s25 = int_to_ptr.vmem [resolvable:$true] %s55_s25 }
  0x15   :  { %v25_v1 = vshrl.u32 %v24_v0, 7  ;;  %s90_s26 = scalar_lea.vmem %s56_s25, 32  ;;  %p95_p9 = scmp.lt.s32.totalorder %s56_s25, %s56_s25 }
  0x16   :  { %p91_p8 = scmp.ne.s32.totalorder %s56_s25, %s90_s26  ;;  %p96_p10 = scmp.lt.s32.totalorder %s90_s26, %s90_s26 }
  0x17   :  { %v26_v2 = vcvt.s32.f32 %v25_v1 }
  0x18   :  { %p97_p11 = por %p96_p10, %p95_p9 }
  0x19   :  { %v29_v3 = vmul.f32 4.0, %v26_v2 }
  0x1a   :  { %p98_p12 = pnand %p97_p11, %p91_p8 }
  0x1b   :  { %v39_v6 = vadd.f32 %v64_v4, %v29_v3 }
  0x1d   :  { %v47_v7 = vmul.f32 %v65_v5, %v39_v6 }
  0x1f   :  { %48 = vst [vmem:[#allocation5] sm:$0x3] %v47_v7 }
  0x20   :  { %101 = shalt.err (!%p98_p12)
}
  0x21   :  { %s102_s28 = scalar_lea.hbm %s162_s2, 32 }
  0x22   :  { %p103_p13 = scmp.ne.s32.totalorder %s162_s2, %s102_s28  ;;  %p106_p0 = scmp.lt.u32.totalorder %s102_s28, %s162_s2 }
  0x24   :  { %p108_p1 = pnand %p106_p0, %p103_p13 }
  0x26   :  { %111 = shalt.err (!%p108_p1)
}
  0x27   :  { %58 = dma.vmem_to_hbm [thread:$0]  %s56_s25, 32, %s162_s2, [#allocation4]  }
  0x28   :  { %114 = dma.done.wait [#allocation4], 32  }
  0x29   :  { %115 = vsyncadd [#allocation4], 4294967264 }
  0x2a   :  { %62 = vsyncpa [#allocation3], 1 }
  0x2b   :  { %63 = vsyncpa [#allocation4], 1 }

</bundles_post_ra>
